<compile_context>
chip_gen: v6e
topology: v6e:2x2x1
jax: 0.10.0
libtpu: 0.0.40
codegen_flags: <defaults>
</compile_context>

<pallas_src>
import functools

import jax
import jax.numpy as jnp
import numpy as np
from jax.experimental import pallas as pl
from jax.experimental.pallas import tpu as pltpu


def _temporal_block_kernel(x_ref, w1_ref, b1_ref, w2_ref, b2_ref, o_ref, xs_ref,
                           *, K, DIL, PAD, L, COUT, COUT_P, HAS_DOWN, BT):
    """One grid step = BT batch elements over the full sequence.

    x_ref : (BT, Cin, L)         unpadded input tile (time on lanes)
    w1_ref: (K, R1, Cin_p)       per-tap conv1 weights; when HAS_DOWN the bottom
                                 Cout_p rows of tap K-1 hold the 1x1 downsample
                                 (zero rows for the other taps)
    b1_ref: (R1, 1)              [b1 ; bd]  (f32)
    w2_ref: (K, Cout_p, Cout_p)  per-tap conv2 weights
    b2_ref: (Cout_p, 1)          (f32)
    o_ref : (BT, Cout, L)        output tile (no channel padding stored)
    xs_ref: (Cin_p, L + 2*PAD)   VMEM staging buffer: causally padded input
    """
    f32 = jnp.float32
    cd = w1_ref.dtype                        # matmul-operand dtype (f32 or bf16)
    cin = x_ref.shape[1]

    # ---- loop-invariant loads (hoisted out of the batch loop) ----
    w1 = w1_ref[...]
    w2 = w2_ref[...]
    b1 = b1_ref[...].astype(f32)
    b2 = b2_ref[...].astype(f32)
    if PAD > 0:
        pad_mask = jax.lax.broadcasted_iota(jnp.int32, (COUT_P, L + PAD), 1) < PAD

    # Zero the staging buffer once per grid step; the batch loop only ever
    # overwrites the data region, so the 2*PAD causal zero columns and the
    # padded channel rows stay zero.  (Replaces the wrapper-side jnp.pad pass.)
    xs_ref[...] = jnp.zeros_like(xs_ref)

    def body(b, carry):
        # Stage this batch element into the causally padded buffer.
        xs_ref[:cin, 2 * PAD:] = x_ref[b]

        # ---- conv1 (+ fused 1x1 downsample rows): accumulate over taps ----
        # No im2col concat: each lane-shifted view feeds the MXU directly.
        acc1 = jnp.zeros((w1.shape[1], L + PAD), f32)
        for j in range(K):
            xj = xs_ref[:, j * DIL: j * DIL + L + PAD]           # (Cin_p, L+PAD)
            acc1 = acc1 + jnp.dot(w1[j], xj.astype(cd),
                                  preferred_element_type=f32)
        acc1 = acc1 + b1

        h1 = jnp.maximum(acc1[:COUT_P], 0.0)                     # relu1
        if PAD > 0:
            h1 = jnp.where(pad_mask, 0.0, h1)    # causal zeros == conv2's padding
        h1c = h1.astype(cd)

        # ---- conv2: accumulate over taps (lane-shifted register views) ----
        acc2 = jnp.zeros((COUT_P, L), f32)
        for j in range(K):
            acc2 = acc2 + jnp.dot(w2[j], h1c[:, j * DIL: j * DIL + L],
                                  preferred_element_type=f32)
        h2 = jnp.maximum(acc2 + b2, 0.0)                         # relu2

        # ---- residual branch ----
        if HAS_DOWN:
            # tap-(K-1) of the extended window at position PAD+t reads x[t],
            # so the fused downsample rows, sliced at [PAD:], are exactly wd@x+bd.
            res = acc1[COUT_P:, PAD:]
        else:
            res = x_ref[b].astype(f32)           # identity (Cin == Cout)

        # ---- add + final ReLU; store only the real Cout rows ----
        o_ref[b] = jnp.maximum(h2[:COUT] + res[:COUT], 0.0).astype(o_ref.dtype)
        return carry

    jax.lax.fori_loop(0, BT, body, 0)


def _round_up(n, m):
    return ((n + m - 1) // m) * m


def temporal_block_forward(x_ncl, w1, b1, w2, b2, wd=None, bd=None, *,
                           kernel_size, dilation, padding,
                           block_batch=None, compute_dtype=None):
    """TemporalBlock forward (inference, dropout = identity).

    x_ncl : (B, Cin, L)   PyTorch NCL layout kept end-to-end.
    w1    : (Cout, Cin, K),  b1: (Cout,)    (weight_norm already folded)
    w2    : (Cout, Cout, K), b2: (Cout,)
    wd,bd : (Cout, Cin, 1), (Cout,)  or None when n_inputs == n_outputs.
    compute_dtype: optional dtype for matmul operands (e.g. jnp.bfloat16);
                   accumulation and all elementwise math stay in f32.
    Returns (B, Cout, L).
    """
    B, Cin, L = x_ncl.shape
    Cout = w1.shape[0]
    K, DIL, PAD = kernel_size, dilation, padding
    assert PAD == (K - 1) * DIL, "causal same-length conv expected"
    has_down = wd is not None
    if not has_down:
        assert Cin == Cout, "identity residual requires n_inputs == n_outputs"

    cdtype = (np.dtype(compute_dtype) if compute_dtype is not None
              else np.dtype(x_ncl.dtype))
    align = 16 if cdtype.itemsize == 2 else 8    # bf16 packs 2 rows per sublane
    Cin_p = _round_up(Cin, align)
    Cout_p = _round_up(Cout, align)
    R1 = 2 * Cout_p if has_down else Cout_p

    # Per-tap weight packing: w1t[j] = w1[:, :, j] (channel-padded).  The 1x1
    # downsample is folded into Cout_p extra output rows on tap K-1 only.
    w1t = jnp.pad(jnp.transpose(w1, (2, 0, 1)),
                  ((0, 0), (0, Cout_p - Cout), (0, Cin_p - Cin)))
    if has_down:
        wd2 = jnp.pad(wd[:, :, 0], ((0, Cout_p - Cout), (0, Cin_p - Cin)))
        down_t = jnp.zeros((K, Cout_p, Cin_p), w1.dtype).at[K - 1].set(wd2)
        w1t = jnp.concatenate([w1t, down_t], axis=1)        # (K, 2*Cout_p, Cin_p)
        b1a = jnp.concatenate([jnp.pad(b1, (0, Cout_p - Cout)),
                               jnp.pad(bd, (0, Cout_p - Cout))])
    else:
        b1a = jnp.pad(b1, (0, Cout_p - Cout))
    b1a = b1a.reshape(R1, 1).astype(jnp.float32)

    w2t = jnp.pad(jnp.transpose(w2, (2, 0, 1)),
                  ((0, 0), (0, Cout_p - Cout), (0, Cout_p - Cout)))
    b2p = jnp.pad(b2, (0, Cout_p - Cout)).reshape(Cout_p, 1).astype(jnp.float32)

    w1t = w1t.astype(cdtype)
    w2t = w2t.astype(cdtype)

    # Batch tile: VMEM-budget aware; keep >= 2 grid steps when B >= 2 so both
    # TensorCores get work on v7x (grid axis is marked "parallel").
    if block_batch is None:
        xbytes = x_ncl.dtype.itemsize
        budget = 24 * 1024 * 1024
        block_batch = 1
        for cand in range(min(B, 8), 0, -1):
            if B % cand:
                continue
            if B >= 2 and B // cand < 2:
                continue
            if 2 * cand * (Cin + Cout) * L * xbytes <= budget:
                block_batch = cand
                break
    Bt = block_batch
    assert B % Bt == 0

    kernel = functools.partial(_temporal_block_kernel, K=K, DIL=DIL, PAD=PAD,
                               L=L, COUT=Cout, COUT_P=Cout_p,
                               HAS_DOWN=has_down, BT=Bt)

    in_specs = [
        pl.BlockSpec((Bt, Cin, L), lambda b: (b, 0, 0)),        # x, unpadded
        pl.BlockSpec((K, R1, Cin_p), lambda b: (0, 0, 0)),      # conv1(+down) taps
        pl.BlockSpec((R1, 1), lambda b: (0, 0)),
        pl.BlockSpec((K, Cout_p, Cout_p), lambda b: (0, 0, 0)),
        pl.BlockSpec((Cout_p, 1), lambda b: (0, 0)),
    ]

    # Advisory cost + VMEM limit with headroom (above the 16/32 MiB scoped
    # defaults on v5e/v6e, capped at v7x's 64 MiB physical VMEM).
    flops = 2 * B * K * (R1 * Cin_p * (L + PAD) + Cout_p * Cout_p * L)
    bytes_accessed = (x_ncl.size * x_ncl.dtype.itemsize
                      + B * Cout * L * x_ncl.dtype.itemsize
                      + (w1t.size + w2t.size) * cdtype.itemsize
                      + (b1a.size + b2p.size) * 4)
    est_vmem = (2 * Bt * (Cin + Cout) * L * x_ncl.dtype.itemsize
                + (w1t.size + w2t.size) * cdtype.itemsize
                + (b1a.size + b2p.size) * 4
                + Cin_p * (L + 2 * PAD) * x_ncl.dtype.itemsize
                + (R1 + 3 * Cout_p) * (L + PAD) * 4)
    vmem_limit = int(min(64 * 1024 * 1024, max(32 * 1024 * 1024, 2 * est_vmem)))

    # TODO(synk): for very long sequences (esp. v7x, 64 MiB VMEM) add an
    # L-tiling grid axis with a 2*PAD halo (+ pl.Buffered(3) on the x spec).
    # TODO(synk): for very short L, fold batch into the lane axis ((C, B*L)
    # layout with per-segment causal zeros) to get >=128-lane dense stores.
    out = pl.pallas_call(
        kernel,
        out_shape=jax.ShapeDtypeStruct((B, Cout, L), x_ncl.dtype),
        grid_spec=pltpu.PrefetchScalarGridSpec(
            num_scalar_prefetch=0,
            grid=(B // Bt,),
            in_specs=in_specs,
            out_specs=pl.BlockSpec((Bt, Cout, L), lambda b: (b, 0, 0)),
            scratch_shapes=[pltpu.VMEM((Cin_p, L + 2 * PAD), x_ncl.dtype)],
        ),
        compiler_params=pltpu.CompilerParams(
            dimension_semantics=("parallel",),
            vmem_limit_bytes=vmem_limit),
        cost_estimate=pl.CostEstimate(flops=int(flops), transcendentals=0,
                                      bytes_accessed=int(bytes_accessed)),
    )(x_ncl, w1t, b1a, w2t, b2p)
    return out


# ------------------------- pure-JAX reference ------------------------------
def _ref_temporal_block(x, w1, b1, w2, b2, wd=None, bd=None, *, dilation, padding):
    def causal_conv(inp, w, b, dil, pad):
        y = jax.lax.conv_general_dilated(
            inp, w, window_strides=(1,), padding=[(pad, 0)],
            rhs_dilation=(dil,), dimension_numbers=("NCH", "OIH", "NCH"))
        return y + b[None, :, None]

    h1 = jnp.maximum(causal_conv(x, w1, b1, dilation, padding), 0.0)   # relu1
    h2 = jnp.maximum(causal_conv(h1, w2, b2, dilation, padding), 0.0)  # relu2
    if wd is None:
        res = x
    else:
        res = jax.lax.conv_general_dilated(
            x, wd, window_strides=(1,), padding=[(0, 0)],
            dimension_numbers=("NCH", "OIH", "NCH")) + bd[None, :, None]
    return jnp.maximum(h2 + res, 0.0)


# ------------------------- deterministic init ------------------------------
def _xavier_uniform(key, shape, gain):
    # shape = (Cout, Cin, K)
    fan_in = shape[1] * shape[2]
    fan_out = shape[0] * shape[2]
    bound = gain * np.sqrt(6.0 / (fan_in + fan_out))
    return jax.random.uniform(key, shape, jnp.float32, -bound, bound)


if __name__ == "__main__":
    key = jax.random.PRNGKey(0)
    ks = jax.random.split(key, 14)
    gain = float(np.sqrt(2.0))

    # --- Case 1: TemporalBlock(n_inputs=4, n_outputs=8, kernel_size=3,
    #             stride=1, dilation=1, padding=2) -> 1x1 downsample residual.
    B, Cin, Cout, K, L = 2, 4, 8, 3, 16
    dil1 = 1
    pad1 = (K - 1) * dil1
    w1 = _xavier_uniform(ks[0], (Cout, Cin, K), gain)
    w2 = _xavier_uniform(ks[1], (Cout, Cout, K), gain)
    wd = _xavier_uniform(ks[2], (Cout, Cin, 1), gain)
    b1 = jax.random.uniform(ks[3], (Cout,), jnp.float32, -0.1, 0.1)
    b2 = jax.random.uniform(ks[4], (Cout,), jnp.float32, -0.1, 0.1)
    bd = jax.random.uniform(ks[5], (Cout,), jnp.float32, -0.1, 0.1)
    x = jax.random.normal(ks[6], (B, Cin, L), jnp.float32)

    out = jax.block_until_ready(temporal_block_forward(
        x, w1, b1, w2, b2, wd, bd,
        kernel_size=K, dilation=dil1, padding=pad1))
    ref = _ref_temporal_block(x, w1, b1, w2, b2, wd, bd,
                              dilation=dil1, padding=pad1)
    np.testing.assert_allclose(np.asarray(out), np.asarray(ref),
                               rtol=1e-5, atol=1e-5)

    # --- Case 2: n_inputs == n_outputs -> identity residual, dilation 2.
    C2, K2, dil2 = 8, 3, 2
    pad2 = (K2 - 1) * dil2
    w1b = _xavier_uniform(ks[7], (C2, C2, K2), gain)
    w2b = _xavier_uniform(ks[8], (C2, C2, K2), gain)
    b1b = jax.random.uniform(ks[9], (C2,), jnp.float32, -0.1, 0.1)
    b2b = jax.random.uniform(ks[10], (C2,), jnp.float32, -0.1, 0.1)
    x2 = jax.random.normal(ks[11], (B, C2, L), jnp.float32)

    out2 = jax.block_until_ready(temporal_block_forward(
        x2, w1b, b1b, w2b, b2b, None, None,
        kernel_size=K2, dilation=dil2, padding=pad2))
    ref2 = _ref_temporal_block(x2, w1b, b1b, w2b, b2b, None, None,
                               dilation=dil2, padding=pad2)
    np.testing.assert_allclose(np.asarray(out2), np.asarray(ref2),
                               rtol=1e-5, atol=1e-5)

    # --- Case 3: bf16 matmul operands (f32 accumulation), looser tolerance.
    out3 = jax.block_until_ready(temporal_block_forward(
        x, w1, b1, w2, b2, wd, bd,
        kernel_size=K, dilation=dil1, padding=pad1,
        compute_dtype=jnp.bfloat16))
    np.testing.assert_allclose(np.asarray(out3), np.asarray(ref),
                               rtol=5e-2, atol=5e-2)

    print("KERNEL_OK")
</pallas_src>

<mosaic_0001>
module attributes {stable_mosaic.version = 11 : i64} {
  func.func @_temporal_block_kernel(%arg0: i32, %arg1: memref<1x4x16xf32, #tpu.memory_space<vmem>>, %arg2: memref<3x16x8xf32, #tpu.memory_space<vmem>>, %arg3: memref<16x1xf32, #tpu.memory_space<vmem>>, %arg4: memref<3x8x8xf32, #tpu.memory_space<vmem>>, %arg5: memref<8x1xf32, #tpu.memory_space<vmem>>, %arg6: memref<1x8x16xf32, #tpu.memory_space<vmem>>, %arg7: memref<8x20xf32, #tpu.memory_space<vmem>>) attributes {dimension_semantics = [#tpu.dimension_semantics<parallel>], iteration_bounds = array<i64: 2>, scalar_prefetch = 0 : i64, scratch_operands = 1 : i64, tpu.core_type = #tpu.core_type<tc>, window_params = [{transform_indices = @transform_0, window_bounds = array<i64: 1, 4, 16>}, {pipeline_mode = #tpu.pipeline_mode<synchronous>, transform_indices = @transform_1, window_bounds = array<i64: 3, 16, 8>}, {pipeline_mode = #tpu.pipeline_mode<synchronous>, transform_indices = @transform_2, window_bounds = array<i64: 16, 1>}, {pipeline_mode = #tpu.pipeline_mode<synchronous>, transform_indices = @transform_3, window_bounds = array<i64: 3, 8, 8>}, {pipeline_mode = #tpu.pipeline_mode<synchronous>, transform_indices = @transform_4, window_bounds = array<i64: 8, 1>}, {transform_indices = @transform_5, window_bounds = array<i64: 1, 8, 16>}]} {
    %c0 = arith.constant 0 : index
    %c0_0 = arith.constant 0 : index
    %c0_1 = arith.constant 0 : index
    %0 = vector.load %arg2[%c0, %c0_0, %c0_1] : memref<3x16x8xf32, #tpu.memory_space<vmem>>, vector<3x16x8xf32>
    %c0_2 = arith.constant 0 : index
    %c0_3 = arith.constant 0 : index
    %c0_4 = arith.constant 0 : index
    %1 = vector.load %arg4[%c0_2, %c0_3, %c0_4] : memref<3x8x8xf32, #tpu.memory_space<vmem>>, vector<3x8x8xf32>
    %c0_5 = arith.constant 0 : index
    %c0_6 = arith.constant 0 : index
    %2 = vector.load %arg3[%c0_5, %c0_6] : memref<16x1xf32, #tpu.memory_space<vmem>>, vector<16x1xf32>
    %c0_7 = arith.constant 0 : index
    %c0_8 = arith.constant 0 : index
    %3 = vector.load %arg5[%c0_7, %c0_8] : memref<8x1xf32, #tpu.memory_space<vmem>>, vector<8x1xf32>
    %4 = tpu.iota {dimensions = array<i32: 1>} : vector<8x18xi32>
    %c2_i32 = arith.constant 2 : i32
    %5 = vector.broadcast %c2_i32 : i32 to vector<8x18xi32>
    %6 = arith.cmpi slt, %4, %5 : vector<8x18xi32>
    %cst = arith.constant 0.000000e+00 : f32
    %7 = vector.broadcast %cst : f32 to vector<8x20xf32>
    %c0_9 = arith.constant 0 : index
    %c0_10 = arith.constant 0 : index
    %8 = vector.load %arg7[%c0_9, %c0_10] : memref<8x20xf32, #tpu.memory_space<vmem>>, vector<8x20xf32>
    tpu.vector_store %arg7[%c0_9, %c0_10], %7 {strides = array<i32>} : memref<8x20xf32, #tpu.memory_space<vmem>>, vector<8x20xf32>,
    %c0_i32 = arith.constant 0 : i32
    %9 = arith.index_cast %c0_i32 : i32 to index
    %c0_11 = arith.constant 0 : index
    %c0_12 = arith.constant 0 : index
    %10 = vector.load %arg1[%9, %c0_11, %c0_12] : memref<1x4x16xf32, #tpu.memory_space<vmem>>, vector<1x4x16xf32>
    %11 = vector.shape_cast %10 : vector<1x4x16xf32> to vector<4x16xf32>
    %c0_13 = arith.constant 0 : index
    %c4 = arith.constant 4 : index
    %12 = vector.load %arg7[%c0_13, %c4] : memref<8x20xf32, #tpu.memory_space<vmem>>, vector<4x16xf32>
    tpu.vector_store %arg7[%c0_13, %c4], %11 {strides = array<i32>} : memref<8x20xf32, #tpu.memory_space<vmem>>, vector<4x16xf32>,
    %cst_14 = arith.constant 0.000000e+00 : f32
    %13 = vector.broadcast %cst_14 : f32 to vector<16x18xf32>
    %c0_15 = arith.constant 0 : index
    %c0_16 = arith.constant 0 : index
    %14 = vector.load %arg7[%c0_15, %c0_16] : memref<8x20xf32, #tpu.memory_space<vmem>>, vector<8x18xf32>
    %15 = vector.extract_strided_slice %0 {offsets = [0, 0, 0], sizes = [1, 16, 8], strides = [1, 1, 1]} : vector<3x16x8xf32> to vector<1x16x8xf32>
    %16 = vector.shape_cast %15 : vector<1x16x8xf32> to vector<16x8xf32>
    %cst_17 = arith.constant dense<0.000000e+00> : vector<16x18xf32>
    %17 = tpu.matmul %16, %14, %cst_17 {dimension_numbers = #tpu.dot_dimension_numbers<[1], [0], [0], [1], [0, 0, 1, 1], [], []>} : vector<16x8xf32>, vector<8x18xf32>, vector<16x18xf32> -> vector<16x18xf32>
    %18 = arith.addf %13, %17 : vector<16x18xf32>
    %c0_18 = arith.constant 0 : index
    %c1 = arith.constant 1 : index
    %19 = vector.load %arg7[%c0_18, %c1] : memref<8x20xf32, #tpu.memory_space<vmem>>, vector<8x18xf32>
    %20 = vector.extract_strided_slice %0 {offsets = [1, 0, 0], sizes = [1, 16, 8], strides = [1, 1, 1]} : vector<3x16x8xf32> to vector<1x16x8xf32>
    %21 = vector.shape_cast %20 : vector<1x16x8xf32> to vector<16x8xf32>
    %cst_19 = arith.constant dense<0.000000e+00> : vector<16x18xf32>
    %22 = tpu.matmul %21, %19, %cst_19 {dimension_numbers = #tpu.dot_dimension_numbers<[1], [0], [0], [1], [0, 0, 1, 1], [], []>} : vector<16x8xf32>, vector<8x18xf32>, vector<16x18xf32> -> vector<16x18xf32>
    %23 = arith.addf %18, %22 : vector<16x18xf32>
    %c0_20 = arith.constant 0 : index
    %c2 = arith.constant 2 : index
    %24 = vector.load %arg7[%c0_20, %c2] : memref<8x20xf32, #tpu.memory_space<vmem>>, vector<8x18xf32>
    %25 = vector.extract_strided_slice %0 {offsets = [2, 0, 0], sizes = [1, 16, 8], strides = [1, 1, 1]} : vector<3x16x8xf32> to vector<1x16x8xf32>
    %26 = vector.shape_cast %25 : vector<1x16x8xf32> to vector<16x8xf32>
    %cst_21 = arith.constant dense<0.000000e+00> : vector<16x18xf32>
    %27 = tpu.matmul %26, %24, %cst_21 {dimension_numbers = #tpu.dot_dimension_numbers<[1], [0], [0], [1], [0, 0, 1, 1], [], []>} : vector<16x8xf32>, vector<8x18xf32>, vector<16x18xf32> -> vector<16x18xf32>
    %28 = arith.addf %23, %27 : vector<16x18xf32>
    %29 = vector.broadcast %2 : vector<16x1xf32> to vector<16x18xf32>
    %30 = arith.addf %28, %29 : vector<16x18xf32>
    %31 = vector.extract_strided_slice %30 {offsets = [0, 0], sizes = [8, 18], strides = [1, 1]} : vector<16x18xf32> to vector<8x18xf32>
    %cst_22 = arith.constant 0.000000e+00 : f32
    %32 = vector.broadcast %cst_22 : f32 to vector<8x18xf32>
    %33 = arith.maximumf %31, %32 : vector<8x18xf32>
    %cst_23 = arith.constant 0.000000e+00 : f32
    %34 = vector.broadcast %cst_23 : f32 to vector<8x18xf32>
    %35 = arith.select %6, %34, %33 : vector<8x18xi1>, vector<8x18xf32>
    %cst_24 = arith.constant 0.000000e+00 : f32
    %36 = vector.broadcast %cst_24 : f32 to vector<8x16xf32>
    %37 = vector.extract_strided_slice %1 {offsets = [0, 0, 0], sizes = [1, 8, 8], strides = [1, 1, 1]} : vector<3x8x8xf32> to vector<1x8x8xf32>
    %38 = vector.shape_cast %37 : vector<1x8x8xf32> to vector<8x8xf32>
    %39 = vector.extract_strided_slice %35 {offsets = [0, 0], sizes = [8, 16], strides = [1, 1]} : vector<8x18xf32> to vector<8x16xf32>
    %cst_25 = arith.constant dense<0.000000e+00> : vector<8x16xf32>
    %40 = tpu.matmul %38, %39, %cst_25 {dimension_numbers = #tpu.dot_dimension_numbers<[1], [0], [0], [1], [0, 0, 1, 1], [], []>} : vector<8x8xf32>, vector<8x16xf32>, vector<8x16xf32> -> vector<8x16xf32>
    %41 = arith.addf %36, %40 : vector<8x16xf32>
    %42 = vector.extract_strided_slice %1 {offsets = [1, 0, 0], sizes = [1, 8, 8], strides = [1, 1, 1]} : vector<3x8x8xf32> to vector<1x8x8xf32>
    %43 = vector.shape_cast %42 : vector<1x8x8xf32> to vector<8x8xf32>
    %44 = vector.extract_strided_slice %35 {offsets = [0, 1], sizes = [8, 16], strides = [1, 1]} : vector<8x18xf32> to vector<8x16xf32>
    %cst_26 = arith.constant dense<0.000000e+00> : vector<8x16xf32>
    %45 = tpu.matmul %43, %44, %cst_26 {dimension_numbers = #tpu.dot_dimension_numbers<[1], [0], [0], [1], [0, 0, 1, 1], [], []>} : vector<8x8xf32>, vector<8x16xf32>, vector<8x16xf32> -> vector<8x16xf32>
    %46 = arith.addf %41, %45 : vector<8x16xf32>
    %47 = vector.extract_strided_slice %1 {offsets = [2, 0, 0], sizes = [1, 8, 8], strides = [1, 1, 1]} : vector<3x8x8xf32> to vector<1x8x8xf32>
    %48 = vector.shape_cast %47 : vector<1x8x8xf32> to vector<8x8xf32>
    %49 = vector.extract_strided_slice %35 {offsets = [0, 2], sizes = [8, 16], strides = [1, 1]} : vector<8x18xf32> to vector<8x16xf32>
    %cst_27 = arith.constant dense<0.000000e+00> : vector<8x16xf32>
    %50 = tpu.matmul %48, %49, %cst_27 {dimension_numbers = #tpu.dot_dimension_numbers<[1], [0], [0], [1], [0, 0, 1, 1], [], []>} : vector<8x8xf32>, vector<8x16xf32>, vector<8x16xf32> -> vector<8x16xf32>
    %51 = arith.addf %46, %50 : vector<8x16xf32>
    %52 = vector.broadcast %3 : vector<8x1xf32> to vector<8x16xf32>
    %53 = arith.addf %51, %52 : vector<8x16xf32>
    %cst_28 = arith.constant 0.000000e+00 : f32
    %54 = vector.broadcast %cst_28 : f32 to vector<8x16xf32>
    %55 = arith.maximumf %53, %54 : vector<8x16xf32>
    %56 = vector.extract_strided_slice %30 {offsets = [8, 2], sizes = [8, 16], strides = [1, 1]} : vector<16x18xf32> to vector<8x16xf32>
    %57 = arith.addf %55, %56 : vector<8x16xf32>
    %cst_29 = arith.constant 0.000000e+00 : f32
    %58 = vector.broadcast %cst_29 : f32 to vector<8x16xf32>
    %59 = arith.maximumf %57, %58 : vector<8x16xf32>
    %60 = arith.index_cast %c0_i32 : i32 to index
    %c0_30 = arith.constant 0 : index
    %c0_31 = arith.constant 0 : index
    %61 = vector.load %arg6[%60, %c0_30, %c0_31] : memref<1x8x16xf32, #tpu.memory_space<vmem>>, vector<1x8x16xf32>
    %62 = vector.shape_cast %61 : vector<1x8x16xf32> to vector<8x16xf32>
    %63 = vector.shape_cast %59 : vector<8x16xf32> to vector<1x8x16xf32>
    tpu.vector_store %arg6[%60, %c0_30, %c0_31], %63 {strides = array<i32>} : memref<1x8x16xf32, #tpu.memory_space<vmem>>, vector<1x8x16xf32>,
    %c1_i32 = arith.constant 1 : i32
    return
  }
  func.func @transform_0(%arg0: i32) -> (i32, i32, i32) {
    %c0_i32 = arith.constant 0 : i32
    %c0_i32_0 = arith.constant 0 : i32
    %c0_i32_1 = arith.constant 0 : i32
    return %arg0, %c0_i32, %c0_i32_0 : i32, i32, i32
  }
  func.func @transform_1(%arg0: i32) -> (i32, i32, i32) {
    %c0_i32 = arith.constant 0 : i32
    %c0_i32_0 = arith.constant 0 : i32
    %c0_i32_1 = arith.constant 0 : i32
    %c0_i32_2 = arith.constant 0 : i32
    return %c0_i32, %c0_i32_0, %c0_i32_1 : i32, i32, i32
  }
  func.func @transform_2(%arg0: i32) -> (i32, i32) {
    %c0_i32 = arith.constant 0 : i32
    %c0_i32_0 = arith.constant 0 : i32
    %c0_i32_1 = arith.constant 0 : i32
    return %c0_i32, %c0_i32_0 : i32, i32
  }
  func.func @transform_3(%arg0: i32) -> (i32, i32, i32) {
    %c0_i32 = arith.constant 0 : i32
    %c0_i32_0 = arith.constant 0 : i32
    %c0_i32_1 = arith.constant 0 : i32
    %c0_i32_2 = arith.constant 0 : i32
    return %c0_i32, %c0_i32_0, %c0_i32_1 : i32, i32, i32
  }
  func.func @transform_4(%arg0: i32) -> (i32, i32) {
    %c0_i32 = arith.constant 0 : i32
    %c0_i32_0 = arith.constant 0 : i32
    %c0_i32_1 = arith.constant 0 : i32
    return %c0_i32, %c0_i32_0 : i32, i32
  }
  func.func @transform_5(%arg0: i32) -> (i32, i32, i32) {
    %c0_i32 = arith.constant 0 : i32
    %c0_i32_0 = arith.constant 0 : i32
    %c0_i32_1 = arith.constant 0 : i32
    return %arg0, %c0_i32, %c0_i32_0 : i32, i32, i32
  }
}

</mosaic_0001>

<bundles_post_ra>
// kernel: tpu_custom_call.1
= control target key start
LH: loop header
LB: loop body
LE: loop exit
PB: predicated region body
PF: predicated region fallthrough
CT: control target
= control target key end

     0   :  { %10 = vsyncpa [#allocation4], 0  ;;  %s1186_s0 = inlined_call_operand.vmem [shape: f32[2,4,16], index: 0, kind: input, shape index: {}]   ;;  %s1187_s1 = inlined_call_operand.vmem [shape: f32[3,16,8], index: 1, kind: input, shape index: {}]   ;;  %s1188_s2 = inlined_call_operand.vmem [shape: f32[16,1], index: 2, kind: input, shape index: {}]   ;;  %s1189_s3 = inlined_call_operand.vmem [shape: f32[3,8,8], index: 3, kind: input, shape index: {}]   ;;  %s1190_s4 = inlined_call_operand.vmem [shape: f32[8,1], index: 4, kind: input, shape index: {}]   ;;  %s1191_s5 = inlined_call_operand.hbm [shape: f32[2,8,16], index: 5, kind: output, shape index: {}]  }
   0x1   :  { %12 = vsyncpa [#allocation4 + $0x1], 0  ;;  %s1039_s18 = smov 0   ;;  %s1041_s19 = smov 0  }
   0x2   :  { %s1043_s20 = smov 0   ;;  %s1045_s21 = smov 0  }
   0x3 LB: > { %s1060_s22 = sadd.s32 4294967295, %s1000_s21   ;;  %s827_s23 = sadd.s32 4294967294, %s1000_s21   ;;  %s1000_s21 = sphi %s1045_s21, %s1197_s21   ;;  %s996_s20 = sphi %s1043_s20, %s1196_s20   ;;  %s992_s19 = sphi %s1041_s19, %s1195_s19   ;;  %s988_s18 = sphi %s1039_s18, %s1194_s18  }
   0x4   : > { %s1064_s24 = sadd.s32 1, %s1000_s21   ;;  %s135_s25 = sadd.s32 1, %s996_s20 }
   0x5   : > { %s132_s26 = ssub.s32 %s1000_s21, %s1064_s24  ;;  %p145_p0 = scmp.ne.s32.totalorder %s996_s20, %s992_s19 }
   0x6   : > { %p133_p1 = scmp.eq.s32.totalorder %s132_s26, 0  ;;  %p146_p2 = scmp.eq.s32.totalorder %s1060_s22, 1 }
   0x7   : > { %p151_p3 = scmp.ne.s32.totalorder %s992_s19, %s988_s18  ;;  %p152_p4 = scmp.eq.s32.totalorder %s827_s23, 1 }
   0x8   : > { %s1075_s27 = scalar_select %p133_p1, %s996_s20, %s135_s25  }
   0x9   : > { %p1077_p5 = por %p146_p2, %p145_p0  ;;  %p1081_p6 = por %p152_p4, %p151_p3 }
   0xa   : > { %p830_p7 = scmp.ge.s32.totalorder %s1000_s21, 1  ;;  %p189_p8 = scmp.lt.s32.totalorder %s1000_s21, 3 }
   0xc   : > { %p190_p9 = pnand %p830_p7, %p189_p8 }
   0xd   : > { %p216_p10 = scmp.lt.s32.totalorder (!%p190_p9), %s1060_s22, 1  ;;  %s1003_s10 = smov (!%p190_p9), 4  }
   0xe   : > { %193 = sbr.rel (%p190_p9) target bundleno = 806 (0x326), region = 40  ;;  %s1005_s15 = smov (!%p190_p9), 126  }
   0xf   : > { %s1006_s16 = smov (!%p190_p9), 127   ;;  %s845_s8 = sshll.u32 (!%p190_p9), %s1060_s22, 7 }
  0x10   : > { %s766_s12 = scalar_lea.hbm (!%p190_p9), %s1191_s5, %s845_s8  ;;  %s1008_s17 = smov (!%p190_p9), [#allocation3]  }
  0x11   : > { %s944_s23 = sshll.u32 (!%p190_p9), %s1008_s17, 4  ;;  %s945_s23 = int_to_ptr.vmem [resolvable:$false] %s944_s23 }
  0x13   : > { %vm235_vm0 = vcmask 162816   ;;  %v1002_v0 = vmov 0.0   ;;  %s217_s30 = scalar_select %p216_p10, %s1060_s22, 1  ;;  %v222_v2 = vld [vmem:[%s1187_s1 + $0x10] sm:$0xff]  ;;  %vm249_vm1 = vcmask 64512   ;;  %v220_v3 = vld [vmem:[%s1187_s1] sm:$0xff]  ;;  %v232_v15 = vlaneseq }
  0x14   : > { %236 = vst.msk [vmem:[#allocation2] sm:$0xff] %vm235_vm0, %v1002_v0  ;;  %vm242_vm2 = vcmask 158752   ;;  %865 = vmatprep.mubr.msk.f32.mxu0 %vm249_vm1, %v222_v2  ;;  %870 = vmatprep.mubr.msk.f32.mxu1 %vm249_vm1, %v220_v3  ;;  %v1004_v5 = vmov 0   ;;  %v221_v7 = vld [vmem:[%s1187_s1 + $0x8] sm:$0xff]  ;;  %v229_v8 = vld [vmem:[%s1188_s2] sm:$0xff]  ;;  %v223_v10 = vld [vmem:[%s1187_s1 + $0x18] sm:$0xff] }
  0x15   : > { %s832_s6 = sshll.u32 %s217_s30, 2  ;;  %938 = vset.pattern.permute.xlu1 %v1004_v5  ;;  %939 = vset.pattern.permute.xlu0 %v1004_v5  ;;  %v224_v11 = vld [vmem:[%s1187_s1 + $0x20] sm:$0xff]  ;;  %v225_v13 = vld [vmem:[%s1187_s1 + $0x28] sm:$0xff]  ;;  %vm1007_vm3 = vmmov 0   ;;  %v233_v20 = vand.u32 127, %v232_v15  ;;  %v228_v36 = vld [vmem:[%s1189_s3 + $0x10] sm:$0xff] }
  0x16   : > { %s219_s9 = scalar_lea.vmem %s1186_s0, %s832_s6  ;;  %v226_v29 = vld [vmem:[%s1189_s3] sm:$0xff]  ;;  %v230_v32 = vld [vmem:[%s1188_s2 + $0x8] sm:$0xff]  ;;  %s213_s6 = sand.u32 1, %s992_s19   ;;  %vm752_vm6 = vcmask 130048  }
  0x17   : > { %v237_v1 = vld [vmem:[%s219_s9] sm:$0xf]  ;;  %vm234_vm4 = vcmp.lt.s32.totalorder %v233_v20, 2  ;;  %v227_v33 = vld [vmem:[%s1189_s3 + $0x8] sm:$0xff]  ;;  %s831_s7 = sshll.u32 %s213_s6, 3  ;;  %s755_s13 = scalar_lea.sflag [#allocation4], %s213_s6 }
  0x18   : > { %239 = vrot.lane.b32.xlu0 %v237_v1, %s1003_s10  ;;  %vm840_vm5 = vmneg %vm234_vm4  ;;  %v231_v31 = vld [vmem:[%s1190_s4] sm:$0xff]  ;;  %s215_s9 = scalar_lea.vmem [#allocation3], %s831_s7  ;;  %s946_s22 = scalar_lea.vmem %s945_s23, 256 }
  0x19   : > { %s768_s10 = sshll.u32 %s215_s9, 4  ;;  %s769_s10 = int_to_ptr.vmem [resolvable:$true] %s768_s10 }
  0x1a   : > { %s940_s14 = scalar_lea.vmem %s769_s10, 128  ;;  %p947_p0 = scmp.lt.s32.totalorder %s769_s10, %s945_s23 }
  0x1b   : > { %p941_p11 = scmp.ne.s32.totalorder %s769_s10, %s940_s14  ;;  %p948_p1 = scmp.lt.s32.totalorder %s946_s22, %s940_s14 }
  0x1d   : > { %p942_p12 = pnand %p941_p11, %p1077_p5  ;;  %p949_p2 = por %p948_p1, %p947_p0 }
  0x1f   : > { %p943_p13 = pneg %p942_p12 }
  0x21   : > { %p950_p3 = pnand %p949_p2, %p943_p13 }
  0x8a   : > { %v240_v4 = vpop.permute.xlu0 %239 }
  0x8b   : > { %243 = vst.msk [vmem:[#allocation2] sm:$0xf] %vm242_vm2, %v240_v4 }
  0x92   : > { %v244_v6 = vld [vmem:[#allocation2] sm:$0xff] }
  0x93   : > { %412 = vrot.lane.b32.xlu1 %v244_v6, %s1005_s15  ;;  %246 = vrot.lane.b32.xlu0 %v244_v6, %s1006_s16 }
  0x94   : > { %868 = vmatprep.subr.mxu1 %v244_v6 }
  0x95   : > { %869 = vmatpush3.msra.mxu1 %v244_v6 }
  0x96   : > { %871 = vmatmul.mubr.msk.f32.vlgmr.msra.gmra.mxu1 %vm249_vm1, %v221_v7  ;;  %878 = vmatprep.subr.mxu1 %v1002_v0 }
  0x97   : > { %500 = vperm.xlu1 %938, %v229_v8   ;;  %880 = vmatprep.mubr.msk.f32.mxu1 %vm1007_vm3, %v1002_v0 }
 0x105   : > { %v247_v9 = vpop.permute.xlu0 %246  ;;  %v413_v12 = vpop.permute.xlu1 %412 }
 0x106   : > { %863 = vmatprep.subr.mxu0 %v247_v9 }
 0x107   : > { %864 = vmatpush3.msra.mxu0 %v247_v9 }
 0x108   : > { %866 = vmatmul.mubr.msk.f32.vlgmr.msra.gmra.mxu0 %vm249_vm1, %v223_v10  ;;  %873 = vmatprep.subr.mxu0 %v413_v12 }
 0x109   : > { %874 = vmatpush3.msra.mxu0 %v413_v12  ;;  %875 = vmatprep.mubr.msk.f32.mxu0 %vm249_vm1, %v224_v11 }
 0x10a   : > { %883 = vmatprep.subr.mxu0 %v1002_v0 }
 0x10c   : > { %876 = vmatmul.mubr.msk.f32.vlgmr.msra.gmra.mxu0 %vm249_vm1, %v225_v13 }
 0x10d   : > { %885 = vmatprep.mubr.msk.f32.mxu0 %vm1007_vm3, %v1002_v0 }
 0x112   : > { %v501_v25 = vpop.permute.xlu1 %500 }
 0x156   : > { %v872_v14 = vpop.f32.mrf.mxu1 }
 0x158   : > { %v403_v18 = vpop.f32.mrf.mxu1 }
 0x1c8   : > { %v867_v16 = vpop.f32.mrf.mxu0 }
 0x1c9   : > { %v409_v19 = vadd.f32 %v872_v14, %v867_v16 }
 0x1ca   : > { %v322_v17 = vpop.f32.mrf.mxu0 }
 0x1cb   : > { %v404_v22 = vadd.f32 %v403_v18, %v322_v17 }
 0x1cc   : > { %v877_v21 = vpop.f32.mrf.mxu0 }
 0x1cd   : > { %v497_v23 = vadd.f32 %v877_v21, %v409_v19 }
 0x1ce   : > { %v487_v24 = vpop.f32.mrf.mxu0 }
 0x1cf   : > { %v496_v26 = vadd.f32 %v487_v24, %v404_v22 }
 0x1d1   : > { %v508_v27 = vadd.f32 %v501_v25, %v496_v26 }
 0x1d3   : > { %v510_v28 = vmax.f32 %v508_v27, 0.0 }
 0x1d5   : > { %884 = vmatpush3.msk.msra.mxu0 %vm840_vm5, %v510_v28  ;;  %v511_v30 = vsel %vm234_vm4, 0.0, %v510_v28 }
 0x1d6   : > { %662 = vrot.lane.b32.xlu1 %v511_v30, %s1005_s15  ;;  %513 = vrot.lane.b32.xlu0 %v511_v30, %s1006_s16 }
 0x1d7   : > { %886 = vmatmul.mubr.msk.f32.vlgmr.msra.gmra.mxu0 %vm249_vm1, %v226_v29 }
 0x1da   : > { %741 = vperm.xlu1 %938, %v231_v31   ;;  %505 = vperm.xlu0 %939, %v230_v32  }
 0x248   : > { %v514_v34 = vpop.permute.xlu0 %513  ;;  %v663_v35 = vpop.permute.xlu1 %662 }
 0x249   : > { %879 = vmatpush3.msra.mxu1 %v514_v34 }
 0x24a   : > { %881 = vmatmul.mubr.msk.f32.vlgmr.msra.gmra.mxu1 %vm249_vm1, %v227_v33  ;;  %888 = vmatprep.subr.mxu1 %v1002_v0 }
 0x24b   : > { %889 = vmatpush3.msra.mxu1 %v663_v35  ;;  %890 = vmatprep.mubr.msk.f32.mxu1 %vm1007_vm3, %v1002_v0 }
 0x24e   : > { %891 = vmatmul.mubr.msk.f32.vlgmr.msra.gmra.mxu1 %vm249_vm1, %v228_v36 }
 0x255   : > { %v506_v37 = vpop.permute.xlu0 %505  ;;  %v742_v46 = vpop.permute.xlu1 %741 }
 0x256   : > { %v509_v38 = vadd.f32 %v506_v37, %v497_v23 }
 0x258   : > { %747 = vrot.lane.b32.xlu1 %v509_v38, %s1005_s15 }
 0x297   : > { %v658_v39 = vpop.f32.mrf.mxu0 }
 0x299   : > { %v887_v40 = vpop.f32.mrf.mxu0 }
 0x2ca   : > { %v748_v50 = vpop.permute.xlu1 %747 }
 0x30a   : > { %v585_v41 = vpop.f32.mrf.mxu1 }
 0x30b   : > { %v659_v43 = vadd.f32 %v658_v39, %v585_v41 }
 0x30c   : > { %v882_v42 = vpop.f32.mrf.mxu1 }
 0x30e   : > { %v734_v44 = vpop.f32.mrf.mxu1 }
 0x30f   : > { %v738_v45 = vadd.f32 %v734_v44, %v659_v43 }
 0x310   : > { %v892_v47 = vpop.f32.mrf.mxu1 }
 0x311   : > { %v744_v48 = vadd.f32 %v742_v46, %v738_v45 }
 0x313   : > { %v745_v49 = vmax.f32 %v744_v48, 0.0 }
 0x315   : > { %v750_v51 = vadd.f32 %v748_v50, %v745_v49 }
 0x317   : > { %v751_v52 = vmax.f32 %v750_v51, 0.0 }
 0x319   : > { %753 = vst.msk [vmem:[%s215_s9] sm:$0xff] %vm752_vm6, %v751_v52 }
 0x31a   : > { %953 = shalt.err (!%p950_p3)
}
 0x31b   : > { %s954_s25 = scalar_lea.hbm %s766_s12, 128  ;;  %s958_s30 = scalar_lea.hbm %s1191_s5, 256 }
 0x31c   : > { %p955_p4 = scmp.ne.s32.totalorder %s766_s12, %s954_s25  ;;  %p959_p9 = scmp.lt.s32.totalorder %s766_s12, %s1191_s5 }
 0x31d   : > { %p960_p10 = scmp.lt.s32.totalorder %s958_s30, %s954_s25 }
 0x31e   : > { %p956_p7 = pnand %p955_p4, %p1077_p5 }
 0x31f   : > { %p961_p11 = por %p960_p10, %p959_p9 }
 0x320   : > { %p957_p8 = pneg %p956_p7 }
 0x322   : > { %p962_p12 = pnand %p961_p11, %p957_p8 }
 0x324   : > { %965 = shalt.err (!%p962_p12)
}
 0x325   : > { %893 = dma.vmem_to_hbm [thread:$0]  (%p1077_p5), %s769_s10, 128, %s766_s12, %s755_s13  }
 0x326 PF: > { %p899_p13 = scmp.ge.s32.totalorder %s1000_s21, 2  ;;  %s780_s8 = sand.u32 1, %s988_s18  }
 0x327   : > { %s781_s9 = scalar_lea.sflag [#allocation4], %s780_s8 }
 0x328   : > { %p896_p0 = pnand %p899_p13, %p1081_p6 }
 0x32a   : > { %p897_p1 = pneg %p896_p0 }
 0x32c   : > { %983 = dma.done.wait (%p897_p1), %s781_s9, 128  }
 0x32d   : > { %985 = vsyncadd (%p897_p1), %s781_s9, 4294967168  ;;  %p15_p2 = scmp.ge.s32.totalorder %s1064_s24, 4   ;;  %s1194_s18 = smov %s992_s19 }
 0x32e   : > { %s1195_s19 = smov %s996_s20  ;;  %s1196_s20 = smov %s1075_s27 }
 0x32f   : > { %s1197_s21 = smov %s1064_s24  ;;  %17 = sbr.rel (!%p15_p2) target bundleno = 3 (0x3), region = 75 }
 0x334   :  { %786 = vsyncpa [#allocation4], 1 }
 0x335   :  { %788 = vsyncpa [#allocation4 + $0x1], 1 }

</bundles_post_ra>
